<compile_context>
chip_gen: v6e
topology: v6e:2x2x1
jax: 0.10.0
libtpu: 0.0.40
codegen_flags: <defaults>
</compile_context>

<pallas_src>
import jax
import jax.numpy as jnp
from jax.experimental import pallas as pl
from jax.experimental.pallas import tpu as pltpu

HIDDEN = 256


def td3_critic_kernel(
    s_ref, a_ref,
    ws1_ref, wa1_ref, b1_ref,
    w21_ref, b21_ref, w22_ref, b22_ref,
    w31_ref, w32_ref, b3_ref,
    q_ref,
):
    s = s_ref[...].astype(jnp.bfloat16)
    a = a_ref[...].astype(jnp.bfloat16)

    # Fused layer 1 for both critics: (TB, 512) in one pass over the batch tile.
    h1 = (
        jnp.dot(s, ws1_ref[...], preferred_element_type=jnp.float32)
        + jnp.dot(a, wa1_ref[...], preferred_element_type=jnp.float32)
        + b1_ref[...]
    )
    h1 = jnp.maximum(h1, 0.0).astype(jnp.bfloat16)

    # Lane-aligned 256-wide slices (multiple of 128 -> no cross-lane shuffles).
    h1a = h1[:, :HIDDEN]
    h1b = h1[:, HIDDEN:]

    # Layer 2: two 256x256 matmuls (one per critic).
    h2a = jnp.maximum(
        jnp.dot(h1a, w21_ref[...], preferred_element_type=jnp.float32) + b21_ref[...],
        0.0,
    ).astype(jnp.bfloat16)
    h2b = jnp.maximum(
        jnp.dot(h1b, w22_ref[...], preferred_element_type=jnp.float32) + b22_ref[...],
        0.0,
    ).astype(jnp.bfloat16)

    # Layer 3: zero-padded (256, 2) weights -> one (TB, 2) result, single store.
    q = (
        jnp.dot(h2a, w31_ref[...], preferred_element_type=jnp.float32)
        + jnp.dot(h2b, w32_ref[...], preferred_element_type=jnp.float32)
        + b3_ref[...]
    )
    q_ref[...] = q.astype(q_ref.dtype)


def init_td3_critic_params(key, state_dim, action_dim, hidden=HIDDEN):
    """Deterministic init mirroring torch.nn.Linear default U[-1/sqrt(fan_in), +],
    laid out in the fused/bf16 format consumed by the kernel."""
    in_dim = state_dim + action_dim

    def linear(k, fan_in, fan_out):
        kw, kb = jax.random.split(k)
        bound = 1.0 / jnp.sqrt(jnp.float32(fan_in))
        w = jax.random.uniform(kw, (fan_in, fan_out), jnp.float32, -bound, bound)
        b = jax.random.uniform(kb, (1, fan_out), jnp.float32, -bound, bound)
        return w, b

    keys = jax.random.split(key, 6)
    w1_1, b1_1 = linear(keys[0], in_dim, hidden)
    w2_1, b2_1 = linear(keys[1], hidden, hidden)
    w3_1, b3_1 = linear(keys[2], hidden, 1)
    w1_2, b1_2 = linear(keys[3], in_dim, hidden)
    w2_2, b2_2 = linear(keys[4], hidden, hidden)
    w3_2, b3_2 = linear(keys[5], hidden, 1)

    # Fused layer-1 weight (in_dim, 2*hidden), pre-split into state/action row blocks.
    w1 = jnp.concatenate([w1_1, w1_2], axis=1)                  # (in_dim, 512)
    ws1 = w1[:state_dim].astype(jnp.bfloat16)                   # (S, 512)
    wa1 = w1[state_dim:].astype(jnp.bfloat16)                   # (A, 512)
    b1 = jnp.concatenate([b1_1, b1_2], axis=1)                  # (1, 512) f32

    # Layer-3 weights zero-padded to (hidden, 2) so the kernel writes one (B, 2).
    z = jnp.zeros((hidden, 1), jnp.float32)
    w31 = jnp.concatenate([w3_1, z], axis=1).astype(jnp.bfloat16)   # (256, 2)
    w32 = jnp.concatenate([z, w3_2], axis=1).astype(jnp.bfloat16)   # (256, 2)
    b3 = jnp.concatenate([b3_1, b3_2], axis=1)                      # (1, 2) f32

    return (
        ws1, wa1, b1,
        w2_1.astype(jnp.bfloat16), b2_1,
        w2_2.astype(jnp.bfloat16), b2_2,
        w31, w32, b3,
    )


@jax.jit
def td3_critic_forward(states, actions, params):
    states = states.astype(jnp.float32)
    actions = actions.astype(jnp.float32)
    B, S = states.shape
    A = actions.shape[1]
    (ws1, wa1, b1, w21, b21, w22, b22, w31, w32, b3) = params

    # Batch tile: MXU-matched when possible (256 for v6e/v7x, 128 for v5e),
    # else fall back to the full (small) batch in a single grid step.
    if B % 256 == 0:
        TB = 256
    elif B % 128 == 0:
        TB = 128
    else:
        TB = B
    grid = (B // TB,)

    act_map = lambda i: (i, 0)   # activations / output advance along the batch
    w_map = lambda i: (0, 0)     # weights stay VMEM-resident across batch tiles

    in_specs = [
        pl.BlockSpec((TB, S), act_map),
        pl.BlockSpec((TB, A), act_map),
        pl.BlockSpec(ws1.shape, w_map),
        pl.BlockSpec(wa1.shape, w_map),
        pl.BlockSpec(b1.shape, w_map),
        pl.BlockSpec(w21.shape, w_map),
        pl.BlockSpec(b21.shape, w_map),
        pl.BlockSpec(w22.shape, w_map),
        pl.BlockSpec(b22.shape, w_map),
        pl.BlockSpec(w31.shape, w_map),
        pl.BlockSpec(w32.shape, w_map),
        pl.BlockSpec(b3.shape, w_map),
    ]
    out_specs = pl.BlockSpec((TB, 2), act_map)

    flops = 2 * B * ((S + A) * 2 * HIDDEN + 2 * HIDDEN * HIDDEN + 2 * HIDDEN * 2)
    bytes_accessed = (
        sum(int(p.size) * p.dtype.itemsize for p in params)
        + states.size * 4 + actions.size * 4 + B * 2 * 4
    )

    q = pl.pallas_call(
        td3_critic_kernel,
        out_shape=jax.ShapeDtypeStruct((B, 2), jnp.float32),
        grid=grid,
        in_specs=in_specs,
        out_specs=out_specs,
        compiler_params=pltpu.CompilerParams(
            dimension_semantics=("parallel",),
        ),
        cost_estimate=pl.CostEstimate(
            flops=flops, transcendentals=0, bytes_accessed=bytes_accessed
        ),
    )(states, actions, ws1, wa1, b1, w21, b21, w22, b22, w31, w32, b3)

    # TODO(synk): for repeated small-batch inference, keep weights VMEM-resident
    # across calls (cross-call prefetch) instead of re-DMA'ing ~0.3 MiB per call.
    return q[:, :1], q[:, 1:]


def _reference(states, actions, params):
    """Plain-JAX reference using the exact same fused bf16 params / casting steps."""
    (ws1, wa1, b1, w21, b21, w22, b22, w31, w32, b3) = params
    s = states.astype(jnp.bfloat16)
    a = actions.astype(jnp.bfloat16)
    h1 = (
        jnp.dot(s, ws1, preferred_element_type=jnp.float32)
        + jnp.dot(a, wa1, preferred_element_type=jnp.float32)
        + b1
    )
    h1 = jnp.maximum(h1, 0.0).astype(jnp.bfloat16)
    h2a = jnp.maximum(
        jnp.dot(h1[:, :HIDDEN], w21, preferred_element_type=jnp.float32) + b21, 0.0
    ).astype(jnp.bfloat16)
    h2b = jnp.maximum(
        jnp.dot(h1[:, HIDDEN:], w22, preferred_element_type=jnp.float32) + b22, 0.0
    ).astype(jnp.bfloat16)
    q = (
        jnp.dot(h2a, w31, preferred_element_type=jnp.float32)
        + jnp.dot(h2b, w32, preferred_element_type=jnp.float32)
        + b3
    )
    return q[:, :1], q[:, 1:]


if __name__ == "__main__":
    key = jax.random.PRNGKey(0)
    k_param, k_s, k_a = jax.random.split(key, 3)

    batch, state_dim, action_dim = 8, 8, 4  # small TD3-style shapes
    params = init_td3_critic_params(k_param, state_dim, action_dim)

    states = jax.random.normal(k_s, (batch, state_dim), jnp.float32)
    actions = jax.random.normal(k_a, (batch, action_dim), jnp.float32)

    q1, q2 = td3_critic_forward(states, actions, params)
    jax.block_until_ready((q1, q2))

    ref1, ref2 = _reference(states, actions, params)
    assert q1.shape == (batch, 1) and q2.shape == (batch, 1)
    assert jnp.allclose(q1, ref1, atol=1e-3, rtol=1e-3)
    assert jnp.allclose(q2, ref2, atol=1e-3, rtol=1e-3)

    print("KERNEL_OK")
</pallas_src>

<mosaic_0001>
module attributes {stable_mosaic.version = 11 : i64} {
  func.func @td3_critic_kernel(%arg0: i32, %arg1: memref<8x8xf32, #tpu.memory_space<vmem>>, %arg2: memref<8x4xf32, #tpu.memory_space<vmem>>, %arg3: memref<8x512xbf16, #tpu.memory_space<vmem>>, %arg4: memref<4x512xbf16, #tpu.memory_space<vmem>>, %arg5: memref<1x512xf32, #tpu.memory_space<vmem>>, %arg6: memref<256x256xbf16, #tpu.memory_space<vmem>>, %arg7: memref<1x256xf32, #tpu.memory_space<vmem>>, %arg8: memref<256x256xbf16, #tpu.memory_space<vmem>>, %arg9: memref<1x256xf32, #tpu.memory_space<vmem>>, %arg10: memref<256x2xbf16, #tpu.memory_space<vmem>>, %arg11: memref<256x2xbf16, #tpu.memory_space<vmem>>, %arg12: memref<1x2xf32, #tpu.memory_space<vmem>>, %arg13: memref<8x2xf32, #tpu.memory_space<vmem>>) attributes {dimension_semantics = [#tpu.dimension_semantics<parallel>], iteration_bounds = array<i64: 1>, scalar_prefetch = 0 : i64, scratch_operands = 0 : i64, tpu.core_type = #tpu.core_type<tc>, window_params = [{transform_indices = @transform_0, window_bounds = array<i64: 8, 8>}, {transform_indices = @transform_1, window_bounds = array<i64: 8, 4>}, {pipeline_mode = #tpu.pipeline_mode<synchronous>, transform_indices = @transform_2, window_bounds = array<i64: 8, 512>}, {pipeline_mode = #tpu.pipeline_mode<synchronous>, transform_indices = @transform_3, window_bounds = array<i64: 4, 512>}, {pipeline_mode = #tpu.pipeline_mode<synchronous>, transform_indices = @transform_4, window_bounds = array<i64: 1, 512>}, {pipeline_mode = #tpu.pipeline_mode<synchronous>, transform_indices = @transform_5, window_bounds = array<i64: 256, 256>}, {pipeline_mode = #tpu.pipeline_mode<synchronous>, transform_indices = @transform_6, window_bounds = array<i64: 1, 256>}, {pipeline_mode = #tpu.pipeline_mode<synchronous>, transform_indices = @transform_7, window_bounds = array<i64: 256, 256>}, {pipeline_mode = #tpu.pipeline_mode<synchronous>, transform_indices = @transform_8, window_bounds = array<i64: 1, 256>}, {pipeline_mode = #tpu.pipeline_mode<synchronous>, transform_indices = @transform_9, window_bounds = array<i64: 256, 2>}, {pipeline_mode = #tpu.pipeline_mode<synchronous>, transform_indices = @transform_10, window_bounds = array<i64: 256, 2>}, {pipeline_mode = #tpu.pipeline_mode<synchronous>, transform_indices = @transform_11, window_bounds = array<i64: 1, 2>}, {transform_indices = @transform_12, window_bounds = array<i64: 8, 2>}]} {
    %c0 = arith.constant 0 : index
    %c0_0 = arith.constant 0 : index
    %0 = vector.load %arg1[%c0, %c0_0] : memref<8x8xf32, #tpu.memory_space<vmem>>, vector<8x8xf32>
    %1 = arith.truncf %0 : vector<8x8xf32> to vector<8x8xbf16>
    %c0_1 = arith.constant 0 : index
    %c0_2 = arith.constant 0 : index
    %2 = vector.load %arg2[%c0_1, %c0_2] : memref<8x4xf32, #tpu.memory_space<vmem>>, vector<8x4xf32>
    %3 = arith.truncf %2 : vector<8x4xf32> to vector<8x4xbf16>
    %c0_3 = arith.constant 0 : index
    %c0_4 = arith.constant 0 : index
    %4 = vector.load %arg3[%c0_3, %c0_4] : memref<8x512xbf16, #tpu.memory_space<vmem>>, vector<8x512xbf16>
    %cst = arith.constant dense<0.000000e+00> : vector<8x512xf32>
    %5 = tpu.matmul %1, %4, %cst {dimension_numbers = #tpu.dot_dimension_numbers<[1], [0], [0], [1], [0, 0, 1, 1], [], []>} : vector<8x8xbf16>, vector<8x512xbf16>, vector<8x512xf32> -> vector<8x512xf32>
    %c0_5 = arith.constant 0 : index
    %c0_6 = arith.constant 0 : index
    %6 = vector.load %arg4[%c0_5, %c0_6] : memref<4x512xbf16, #tpu.memory_space<vmem>>, vector<4x512xbf16>
    %cst_7 = arith.constant dense<0.000000e+00> : vector<8x512xf32>
    %7 = tpu.matmul %3, %6, %cst_7 {dimension_numbers = #tpu.dot_dimension_numbers<[1], [0], [0], [1], [0, 0, 1, 1], [], []>} : vector<8x4xbf16>, vector<4x512xbf16>, vector<8x512xf32> -> vector<8x512xf32>
    %8 = arith.addf %5, %7 : vector<8x512xf32>
    %c0_8 = arith.constant 0 : index
    %c0_9 = arith.constant 0 : index
    %9 = vector.load %arg5[%c0_8, %c0_9] : memref<1x512xf32, #tpu.memory_space<vmem>>, vector<1x512xf32>
    %10 = vector.broadcast %9 : vector<1x512xf32> to vector<8x512xf32>
    %11 = arith.addf %8, %10 : vector<8x512xf32>
    %cst_10 = arith.constant 0.000000e+00 : f32
    %12 = vector.broadcast %cst_10 : f32 to vector<8x512xf32>
    %13 = arith.maximumf %11, %12 : vector<8x512xf32>
    %14 = arith.truncf %13 : vector<8x512xf32> to vector<8x512xbf16>
    %15 = vector.extract_strided_slice %14 {offsets = [0, 0], sizes = [8, 256], strides = [1, 1]} : vector<8x512xbf16> to vector<8x256xbf16>
    %16 = vector.extract_strided_slice %14 {offsets = [0, 256], sizes = [8, 256], strides = [1, 1]} : vector<8x512xbf16> to vector<8x256xbf16>
    %c0_11 = arith.constant 0 : index
    %c0_12 = arith.constant 0 : index
    %17 = vector.load %arg6[%c0_11, %c0_12] : memref<256x256xbf16, #tpu.memory_space<vmem>>, vector<256x256xbf16>
    %cst_13 = arith.constant dense<0.000000e+00> : vector<8x256xf32>
    %18 = tpu.matmul %15, %17, %cst_13 {dimension_numbers = #tpu.dot_dimension_numbers<[1], [0], [0], [1], [0, 0, 1, 1], [], []>} : vector<8x256xbf16>, vector<256x256xbf16>, vector<8x256xf32> -> vector<8x256xf32>
    %c0_14 = arith.constant 0 : index
    %c0_15 = arith.constant 0 : index
    %19 = vector.load %arg7[%c0_14, %c0_15] : memref<1x256xf32, #tpu.memory_space<vmem>>, vector<1x256xf32>
    %20 = vector.broadcast %19 : vector<1x256xf32> to vector<8x256xf32>
    %21 = arith.addf %18, %20 : vector<8x256xf32>
    %cst_16 = arith.constant 0.000000e+00 : f32
    %22 = vector.broadcast %cst_16 : f32 to vector<8x256xf32>
    %23 = arith.maximumf %21, %22 : vector<8x256xf32>
    %24 = arith.truncf %23 : vector<8x256xf32> to vector<8x256xbf16>
    %c0_17 = arith.constant 0 : index
    %c0_18 = arith.constant 0 : index
    %25 = vector.load %arg8[%c0_17, %c0_18] : memref<256x256xbf16, #tpu.memory_space<vmem>>, vector<256x256xbf16>
    %cst_19 = arith.constant dense<0.000000e+00> : vector<8x256xf32>
    %26 = tpu.matmul %16, %25, %cst_19 {dimension_numbers = #tpu.dot_dimension_numbers<[1], [0], [0], [1], [0, 0, 1, 1], [], []>} : vector<8x256xbf16>, vector<256x256xbf16>, vector<8x256xf32> -> vector<8x256xf32>
    %c0_20 = arith.constant 0 : index
    %c0_21 = arith.constant 0 : index
    %27 = vector.load %arg9[%c0_20, %c0_21] : memref<1x256xf32, #tpu.memory_space<vmem>>, vector<1x256xf32>
    %28 = vector.broadcast %27 : vector<1x256xf32> to vector<8x256xf32>
    %29 = arith.addf %26, %28 : vector<8x256xf32>
    %cst_22 = arith.constant 0.000000e+00 : f32
    %30 = vector.broadcast %cst_22 : f32 to vector<8x256xf32>
    %31 = arith.maximumf %29, %30 : vector<8x256xf32>
    %32 = arith.truncf %31 : vector<8x256xf32> to vector<8x256xbf16>
    %c0_23 = arith.constant 0 : index
    %c0_24 = arith.constant 0 : index
    %33 = vector.load %arg10[%c0_23, %c0_24] : memref<256x2xbf16, #tpu.memory_space<vmem>>, vector<256x2xbf16>
    %cst_25 = arith.constant dense<0.000000e+00> : vector<8x2xf32>
    %34 = tpu.matmul %24, %33, %cst_25 {dimension_numbers = #tpu.dot_dimension_numbers<[1], [0], [0], [1], [0, 0, 1, 1], [], []>} : vector<8x256xbf16>, vector<256x2xbf16>, vector<8x2xf32> -> vector<8x2xf32>
    %c0_26 = arith.constant 0 : index
    %c0_27 = arith.constant 0 : index
    %35 = vector.load %arg11[%c0_26, %c0_27] : memref<256x2xbf16, #tpu.memory_space<vmem>>, vector<256x2xbf16>
    %cst_28 = arith.constant dense<0.000000e+00> : vector<8x2xf32>
    %36 = tpu.matmul %32, %35, %cst_28 {dimension_numbers = #tpu.dot_dimension_numbers<[1], [0], [0], [1], [0, 0, 1, 1], [], []>} : vector<8x256xbf16>, vector<256x2xbf16>, vector<8x2xf32> -> vector<8x2xf32>
    %37 = arith.addf %34, %36 : vector<8x2xf32>
    %c0_29 = arith.constant 0 : index
    %c0_30 = arith.constant 0 : index
    %38 = vector.load %arg12[%c0_29, %c0_30] : memref<1x2xf32, #tpu.memory_space<vmem>>, vector<1x2xf32>
    %39 = vector.broadcast %38 : vector<1x2xf32> to vector<8x2xf32>
    %40 = arith.addf %37, %39 : vector<8x2xf32>
    %c0_31 = arith.constant 0 : index
    %c0_32 = arith.constant 0 : index
    %41 = vector.load %arg13[%c0_31, %c0_32] : memref<8x2xf32, #tpu.memory_space<vmem>>, vector<8x2xf32>
    tpu.vector_store %arg13[%c0_31, %c0_32], %40 {strides = array<i32>} : memref<8x2xf32, #tpu.memory_space<vmem>>, vector<8x2xf32>,
    return
  }
  func.func @transform_0(%arg0: i32) -> (i32, i32) {
    %c0_i32 = arith.constant 0 : i32
    %c0_i32_0 = arith.constant 0 : i32
    return %arg0, %c0_i32 : i32, i32
  }
  func.func @transform_1(%arg0: i32) -> (i32, i32) {
    %c0_i32 = arith.constant 0 : i32
    %c0_i32_0 = arith.constant 0 : i32
    return %arg0, %c0_i32 : i32, i32
  }
  func.func @transform_2(%arg0: i32) -> (i32, i32) {
    %c0_i32 = arith.constant 0 : i32
    %c0_i32_0 = arith.constant 0 : i32
    %c0_i32_1 = arith.constant 0 : i32
    return %c0_i32, %c0_i32_0 : i32, i32
  }
  func.func @transform_3(%arg0: i32) -> (i32, i32) {
    %c0_i32 = arith.constant 0 : i32
    %c0_i32_0 = arith.constant 0 : i32
    %c0_i32_1 = arith.constant 0 : i32
    return %c0_i32, %c0_i32_0 : i32, i32
  }
  func.func @transform_4(%arg0: i32) -> (i32, i32) {
    %c0_i32 = arith.constant 0 : i32
    %c0_i32_0 = arith.constant 0 : i32
    %c0_i32_1 = arith.constant 0 : i32
    return %c0_i32, %c0_i32_0 : i32, i32
  }
  func.func @transform_5(%arg0: i32) -> (i32, i32) {
    %c0_i32 = arith.constant 0 : i32
    %c0_i32_0 = arith.constant 0 : i32
    %c0_i32_1 = arith.constant 0 : i32
    return %c0_i32, %c0_i32_0 : i32, i32
  }
  func.func @transform_6(%arg0: i32) -> (i32, i32) {
    %c0_i32 = arith.constant 0 : i32
    %c0_i32_0 = arith.constant 0 : i32
    %c0_i32_1 = arith.constant 0 : i32
    return %c0_i32, %c0_i32_0 : i32, i32
  }
  func.func @transform_7(%arg0: i32) -> (i32, i32) {
    %c0_i32 = arith.constant 0 : i32
    %c0_i32_0 = arith.constant 0 : i32
    %c0_i32_1 = arith.constant 0 : i32
    return %c0_i32, %c0_i32_0 : i32, i32
  }
  func.func @transform_8(%arg0: i32) -> (i32, i32) {
    %c0_i32 = arith.constant 0 : i32
    %c0_i32_0 = arith.constant 0 : i32
    %c0_i32_1 = arith.constant 0 : i32
    return %c0_i32, %c0_i32_0 : i32, i32
  }
  func.func @transform_9(%arg0: i32) -> (i32, i32) {
    %c0_i32 = arith.constant 0 : i32
    %c0_i32_0 = arith.constant 0 : i32
    %c0_i32_1 = arith.constant 0 : i32
    return %c0_i32, %c0_i32_0 : i32, i32
  }
  func.func @transform_10(%arg0: i32) -> (i32, i32) {
    %c0_i32 = arith.constant 0 : i32
    %c0_i32_0 = arith.constant 0 : i32
    %c0_i32_1 = arith.constant 0 : i32
    return %c0_i32, %c0_i32_0 : i32, i32
  }
  func.func @transform_11(%arg0: i32) -> (i32, i32) {
    %c0_i32 = arith.constant 0 : i32
    %c0_i32_0 = arith.constant 0 : i32
    %c0_i32_1 = arith.constant 0 : i32
    return %c0_i32, %c0_i32_0 : i32, i32
  }
  func.func @transform_12(%arg0: i32) -> (i32, i32) {
    %c0_i32 = arith.constant 0 : i32
    %c0_i32_0 = arith.constant 0 : i32
    return %arg0, %c0_i32 : i32, i32
  }
}

</mosaic_0001>

<bundles_post_ra>
// kernel: td3_critic_forward.1
= control target key start
LH: loop header
LB: loop body
LE: loop exit
PB: predicated region body
PF: predicated region fallthrough
CT: control target
= control target key end

     0   :  { %17 = vsyncpa [#allocation3], 0  ;;  %s1871_s0 = inlined_call_operand.vmem [shape: f32[8,8], index: 0, kind: input, shape index: {}]   ;;  %s1872_s1 = inlined_call_operand.vmem [shape: f32[8,4], index: 1, kind: input, shape index: {}]   ;;  %s1873_s2 = inlined_call_operand.vmem [shape: bf16[8,512], index: 2, kind: input, shape index: {}]   ;;  %s1874_s3 = inlined_call_operand.hbm [shape: bf16[4,512], index: 3, kind: input, shape index: {}]   ;;  %s1875_s4 = inlined_call_operand.hbm [shape: f32[1,512], index: 4, kind: input, shape index: {}]   ;;  %s1876_s5 = inlined_call_operand.vmem [shape: bf16[256,256], index: 5, kind: input, shape index: {}]   ;;  %s1877_s6 = inlined_call_operand.vmem [shape: f32[1,256], index: 6, kind: input, shape index: {}]   ;;  %s1878_s7 = inlined_call_operand.hbm [shape: bf16[256,256], index: 7, kind: input, shape index: {}]   ;;  %s1879_s8 = inlined_call_operand.vmem [shape: f32[1,256], index: 8, kind: input, shape index: {}]   ;;  %s1880_s9 = inlined_call_operand.vmem [shape: bf16[256,2], index: 9, kind: input, shape index: {}]   ;;  %s1881_s10 = inlined_call_operand.vmem [shape: bf16[256,2], index: 10, kind: input, shape index: {}]   ;;  %s1882_s11 = inlined_call_operand.vmem [shape: f32[1,2], index: 11, kind: input, shape index: {}]   ;;  %s1883_s12 = inlined_call_operand.vmem [shape: f32[8,2], index: 12, kind: output, shape index: {}]  }
   0x1   :  { %18 = vsyncpa [#allocation5], 0  ;;  %s1553_s21 = smov [#allocation4]   ;;  %s1554_s23 = smov [#allocation2]  }
   0x2   :  { %s41_s22 = sshll.u32 %s1553_s21, 4  ;;  %s31_s24 = sshll.u32 %s1554_s23, 4  ;;  %s42_s22 = int_to_ptr.vmem [resolvable:$true] %s41_s22  ;;  %s32_s24 = int_to_ptr.vmem [resolvable:$true] %s31_s24 }
   0x3   :  { %s1497_s25 = scalar_lea.vmem %s42_s22, 64  ;;  %p1502_p1 = scmp.lt.s32.totalorder %s42_s22, %s42_s22 }
   0x4   :  { %p1498_p0 = scmp.ne.s32.totalorder %s42_s22, %s1497_s25  ;;  %p1503_p2 = scmp.lt.s32.totalorder %s1497_s25, %s1497_s25 }
   0x6   :  { %p1504_p3 = por %p1503_p2, %p1502_p1 }
   0x8   :  { %p1505_p4 = pnand %p1504_p3, %p1498_p0 }
   0xa   :  { %1508 = shalt.err (!%p1505_p4)
}
   0xb   :  { %44 = dma.hbm_to_vmem [thread:$0]  %s1875_s4, 64, %s42_s22, [#allocation5]  }
   0xc   :  { %s1517_s28 = scalar_lea.vmem %s32_s24, 128  ;;  %p1522_p6 = scmp.lt.s32.totalorder %s32_s24, %s32_s24 }
   0xd   :  { %p1518_p5 = scmp.ne.s32.totalorder %s32_s24, %s1517_s28  ;;  %p1523_p7 = scmp.lt.s32.totalorder %s1517_s28, %s1517_s28 }
   0xf   :  { %p1524_p8 = por %p1523_p7, %p1522_p6 }
  0x11   :  { %p1525_p9 = pnand %p1524_p8, %p1518_p5 }
  0x13   :  { %1528 = shalt.err (!%p1525_p9)
}
  0x14   :  { %34 = dma.hbm_to_vmem [thread:$0]  %s1874_s3, 128, %s32_s24, [#allocation3]  }
  0x15   :  { %s1555_s13 = smov [#allocation6]  }
  0x16   :  { %s54_s14 = sshll.u32 %s1555_s13, 4  ;;  %s55_s14 = int_to_ptr.vmem [resolvable:$true] %s54_s14 }
  0x17   :  { %s1537_s15 = scalar_lea.vmem %s55_s14, 4096  ;;  %p1542_p11 = scmp.lt.s32.totalorder %s55_s14, %s55_s14 }
  0x18   :  { %p1538_p10 = scmp.ne.s32.totalorder %s55_s14, %s1537_s15  ;;  %p1543_p12 = scmp.lt.s32.totalorder %s1537_s15, %s1537_s15 }
  0x1a   :  { %p1544_p13 = por %p1543_p12, %p1542_p11 }
  0x1c   :  { %p1545_p0 = pnand %p1544_p13, %p1538_p10 }
  0x1e   :  { %1548 = shalt.err (!%p1545_p0)
}
  0x1f   :  { %s1556_s4 = smov 128   ;;  %s1557_s16 = smov 8  }
  0x20   :  { %60 = dma.hbm_to_vmem [thread:$0]  %s1878_s7, 4096, %s55_s14, [#allocation5], %s1556_s4, %s1556_s4, %s1557_s16  }
  0x21   :  { %1549 = dma.done.wait [#allocation3], 128  }
  0x22   :  { %1550 = vsyncadd [#allocation3], 4294967168 }
  0x23   :  { %1551 = dma.done.wait [#allocation5], 4160  }
  0x24   :  { %1552 = vsyncadd [#allocation5], 4294963136  ;;  %v91_v0 = vlaneseq  ;;  %v1558_v1 = vmov 1983009808   ;;  %v1559_v3 = vmov 0   ;;  %v85_v7 = vld [vmem:[#allocation2] sm:$0xff] }
  0x25   :  { %v89_v2 = vunpack.c.l.s4 %v1558_v1  ;;  %153 = vmatprep.mubr.bf16.mxu0 %v1559_v3  ;;  %194 = vmatprep.mubr.bf16.mxu1 %v1559_v3  ;;  %vm108_vm0 = vcmask 1041408   ;;  %v83_v8 = vld [vmem:[%s1873_s2] sm:$0xff]  ;;  %v87_v10 = vcombine.high %v85_v7, %v85_v7  ;;  %v84_v13 = vld [vmem:[%s1873_s2 + $0x8] sm:$0xff]  ;;  %vm217_vm1 = vcmask 1043456   ;;  %v1363_v24 = vld [vmem:[%s1876_s5 + $0x74] ss:$8 sps:$4 sm:$0xff]  }
  0x26   :  { %v1634_v4 = vshrl.u32 %v91_v0, 7  ;;  %v81_v11 = vld [vmem:[%s1872_s1] sm:$0xff]  ;;  %v1201_v12 = vcombine.high %v83_v8, %v83_v8  ;;  %v1200_v17 = vcombine.low %v83_v8, %v83_v8  ;;  %v1203_v21 = vcombine.high %v84_v13, %v84_v13  ;;  %v1361_v29 = vld [vmem:[%s1876_s5 + $0x70] ss:$8 sps:$4 sm:$0xff]   ;;  %v1375_v34 = vld [vmem:[%s1876_s5 + $0x54] ss:$8 sps:$4 sm:$0xff]  }
  0x27   :  { %v90_v5 = vunpack.c.0.s8 %v89_v2  ;;  %v82_v18 = vpack.c.bf16 %v81_v11, %v81_v11  ;;  %v1202_v22 = vcombine.low %v84_v13, %v84_v13  ;;  %vm104_vm2 = vcmask 31744   ;;  %v1366_v26 = vld [vmem:[#allocation6 + $0x74] ss:$8 sps:$4 sm:$0xff]   ;;  %v1369_v30 = vld [vmem:[%s1876_s5 + $0x64] ss:$8 sps:$4 sm:$0xff]  }
  0x28   :  { %v219_v23 = vsel %vm217_vm1, %v1200_v17, 0  ;;  %v79_v27 = vld [vmem:[%s1871_s0] sm:$0xff]  ;;  %vm213_vm3 = vcmask 64512   ;;  %v1372_v32 = vld [vmem:[#allocation6 + $0x64] ss:$8 sps:$4 sm:$0xff]   ;;  %vm1188_vm4 = vcmask 15360  }
  0x29   :  { %v93_v6 = vsub.s32 %v90_v5, %v1634_v4  ;;  %v225_v25 = vsel %vm217_vm1, %v1202_v22, 0  ;;  %v80_v28 = vpack.c.bf16 %v79_v27, %v79_v27  ;;  %v1364_v31 = vld [vmem:[#allocation6 + $0x70] ss:$8 sps:$4 sm:$0xff]   ;;  %v1367_v33 = vld [vmem:[%s1876_s5 + $0x60] ss:$8 sps:$4 sm:$0xff]  }
  0x2a   :  { %v1370_v35 = vld [vmem:[#allocation6 + $0x60] ss:$8 sps:$4 sm:$0xff]   ;;  %v1378_v36 = vld [vmem:[#allocation6 + $0x54] ss:$8 sps:$4 sm:$0xff]   ;;  %v1373_v37 = vld [vmem:[%s1876_s5 + $0x50] ss:$8 sps:$4 sm:$0xff]  }
  0x2b   :  { %v94_v9 = vrot.slane %v85_v7, %v93_v6  ;;  %v101_v16 = vrot.slane %v87_v10, %v93_v6  ;;  %v1381_v38 = vld [vmem:[%s1876_s5 + $0x44] ss:$8 sps:$4 sm:$0xff]   ;;  %v1384_v40 = vld [vmem:[#allocation6 + $0x44] ss:$8 sps:$4 sm:$0xff]   ;;  %v1379_v41 = vld [vmem:[%s1876_s5 + $0x40] ss:$8 sps:$4 sm:$0xff]  }
  0x2c   :  { %v1376_v39 = vld [vmem:[#allocation6 + $0x50] ss:$8 sps:$4 sm:$0xff]   ;;  %v1382_v43 = vld [vmem:[#allocation6 + $0x40] ss:$8 sps:$4 sm:$0xff]   ;;  %v1385_v44 = vld [vmem:[%s1876_s5 + $0x30] ss:$8 sps:$4 sm:$0xff]  }
  0x2d   :  { %v102_v14 = vcombine.high %v94_v9, %v94_v9  ;;  %v110_v15 = vsel %vm108_vm0, %v94_v9, 0  ;;  %v103_v19 = vcombine.high %v101_v16, %v101_v16  ;;  %v116_v20 = vsel %vm108_vm0, %v101_v16, 0  ;;  %v1387_v42 = vld [vmem:[%s1876_s5 + $0x34] ss:$8 sps:$4 sm:$0xff]   ;;  %v1390_v45 = vld [vmem:[#allocation6 + $0x34] ss:$8 sps:$4 sm:$0xff]  }
  0x2e   :  { %v1388_v46 = vld [vmem:[#allocation6 + $0x30] ss:$8 sps:$4 sm:$0xff]   ;;  %v1396_v48 = vld [vmem:[#allocation6 + $0x24] ss:$8 sps:$4 sm:$0xff]   ;;  %v1391_v49 = vld [vmem:[%s1876_s5 + $0x20] ss:$8 sps:$4 sm:$0xff]  }
  0x2f   :  { %1196 = vmatprep.subr.msk.bf16.mxu0 %vm108_vm0, %v102_v14  ;;  %1198 = vmatprep.subr.msk.bf16.mxu1 %vm108_vm0, %v103_v19  ;;  %v1393_v47 = vld [vmem:[%s1876_s5 + $0x24] ss:$8 sps:$4 sm:$0xff]   ;;  %v1399_v50 = vld [vmem:[%s1876_s5 + $0x14] ss:$8 sps:$4 sm:$0xff]   ;;  %v1402_v52 = vld [vmem:[#allocation6 + $0x14] ss:$8 sps:$4 sm:$0xff]  }
  0x30   :  { %136 = vmatpush1.bf16.msra.mxu0 %v110_v15  ;;  %177 = vmatpush1.bf16.msra.mxu1 %v116_v20  ;;  %v1394_v51 = vld [vmem:[#allocation6 + $0x20] ss:$8 sps:$4 sm:$0xff]   ;;  %v1397_v53 = vld [vmem:[%s1876_s5 + $0x10] ss:$8 sps:$4 sm:$0xff]   ;;  %v1400_v55 = vld [vmem:[#allocation6 + $0x10] ss:$8 sps:$4 sm:$0xff]  }
  0x31   :  { %1204 = vmatprep.subr.msk.bf16.mxu0 %vm217_vm1, %v1201_v12  ;;  %1206 = vmatprep.subr.msk.bf16.mxu1 %vm217_vm1, %v1203_v21  ;;  %v1405_v54 = vld [vmem:[%s1876_s5 + $0x4] ss:$8 sps:$4 sm:$0xff]   ;;  %v1408_v56 = vld [vmem:[#allocation6 + $0x4] ss:$8 sps:$4 sm:$0xff]   ;;  %v1403_v57 = vld [vmem:[%s1876_s5] ss:$8 sps:$4 sm:$0xff]  }
  0x32   :  { %v1411_v58 = vld [vmem:[%s1876_s5 + $0xf4] ss:$8 sps:$4 sm:$0xff]   ;;  %v1414_v60 = vld [vmem:[#allocation6 + $0xf4] ss:$8 sps:$4 sm:$0xff]   ;;  %v1409_v61 = vld [vmem:[%s1876_s5 + $0xf0] ss:$8 sps:$4 sm:$0xff]  }
  0x33   :  { %1197 = vmatmul.mubr.msk.bf16.vlgmr.msra.gmra.mxu0 %vm104_vm2, %v82_v18  ;;  %1199 = vmatmul.mubr.msk.bf16.vlgmr.msra.gmra.mxu1 %vm104_vm2, %v82_v18  ;;  %v1406_v59 = vld [vmem:[#allocation6] ss:$8 sps:$4 sm:$0xff]   ;;  %v1412_v63 = vld [vmem:[#allocation6 + $0xf0] ss:$8 sps:$4 sm:$0xff]   ;;  %v1420_v0 = vld [vmem:[#allocation6 + $0xe4] ss:$8 sps:$4 sm:$0xff]  }
  0x34   :  { %245 = vmatpush1.bf16.msra.mxu0 %v219_v23  ;;  %262 = vmatprep.mubr.bf16.mxu0 %v1559_v3  ;;  %v1417_v62 = vld [vmem:[%s1876_s5 + $0xe4] ss:$8 sps:$4 sm:$0xff]   ;;  %v1415_v1 = vld [vmem:[%s1876_s5 + $0xe0] ss:$8 sps:$4 sm:$0xff]   ;;  %v1423_v2 = vld [vmem:[%s1876_s5 + $0xd4] ss:$8 sps:$4 sm:$0xff]  }
  0x35   :  { %550 = vmatprep.subr.bf16.mxu0 %v1363_v24  ;;  %286 = vmatpush1.bf16.msra.mxu1 %v225_v25  ;;  %v1426_v5 = vld [vmem:[#allocation6 + $0xd4] ss:$8 sps:$4 sm:$0xff]   ;;  %v1421_v6 = vld [vmem:[%s1876_s5 + $0xd0] ss:$8 sps:$4 sm:$0xff]   ;;  %v1424_v7 = vld [vmem:[#allocation6 + $0xd0] ss:$8 sps:$4 sm:$0xff]  }
  0x36   :  { %303 = vmatprep.mubr.bf16.mxu1 %v1559_v3  ;;  %799 = vmatprep.subr.bf16.mxu1 %v1366_v26  ;;  %v1418_v3 = vld [vmem:[#allocation6 + $0xe0] ss:$8 sps:$4 sm:$0xff]   ;;  %v1427_v9 = vld [vmem:[%s1876_s5 + $0xc0] ss:$8 sps:$4 sm:$0xff]   ;;  %v1432_v10 = vld [vmem:[#allocation6 + $0xc4] ss:$8 sps:$4 sm:$0xff]  }
  0x37   :  { %v1429_v8 = vld [vmem:[%s1876_s5 + $0xc4] ss:$8 sps:$4 sm:$0xff]   ;;  %v1435_v12 = vld [vmem:[%s1876_s5 + $0xb4] ss:$8 sps:$4 sm:$0xff]   ;;  %v1433_v13 = vld [vmem:[%s1876_s5 + $0xb0] ss:$8 sps:$4 sm:$0xff]  }
  0x38   :  { %v1430_v11 = vld [vmem:[#allocation6 + $0xc0] ss:$8 sps:$4 sm:$0xff]   ;;  %v1438_v14 = vld [vmem:[#allocation6 + $0xb4] ss:$8 sps:$4 sm:$0xff]   ;;  %v1436_v15 = vld [vmem:[#allocation6 + $0xb0] ss:$8 sps:$4 sm:$0xff]  }
  0x39   :  { %v1441_v16 = vld [vmem:[%s1876_s5 + $0xa4] ss:$8 sps:$4 sm:$0xff]   ;;  %v1439_v17 = vld [vmem:[%s1876_s5 + $0xa0] ss:$8 sps:$4 sm:$0xff]   ;;  %v1444_v18 = vld [vmem:[#allocation6 + $0xa4] ss:$8 sps:$4 sm:$0xff]  }
  0x3a   :  { %v1442_v19 = vld [vmem:[#allocation6 + $0xa0] ss:$8 sps:$4 sm:$0xff]   ;;  %v1445_v21 = vld [vmem:[%s1876_s5 + $0x90] ss:$8 sps:$4 sm:$0xff]   ;;  %v1450_v22 = vld [vmem:[#allocation6 + $0x94] ss:$8 sps:$4 sm:$0xff]  }
  0x3b   :  { %1205 = vmatmul.mubr.msk.bf16.vlgmr.msra.gmra.mxu0 %vm213_vm3, %v80_v28  ;;  %1207 = vmatmul.mubr.msk.bf16.vlgmr.msra.gmra.mxu1 %vm213_vm3, %v80_v28  ;;  %v1447_v20 = vld [vmem:[%s1876_s5 + $0x94] ss:$8 sps:$4 sm:$0xff]   ;;  %v1453_v24 = vld [vmem:[%s1876_s5 + $0x84] ss:$8 sps:$4 sm:$0xff]   ;;  %v1451_v25 = vld [vmem:[%s1876_s5 + $0x80] ss:$8 sps:$4 sm:$0xff]  }
  0x3c   :  { %551 = vmatpush1.bf16.msra.mxu0 %v1361_v29  ;;  %800 = vmatpush1.bf16.msra.mxu1 %v1364_v31  ;;  %v1448_v23 = vld [vmem:[#allocation6 + $0x90] ss:$8 sps:$4 sm:$0xff]   ;;  %v1456_v26 = vld [vmem:[#allocation6 + $0x84] ss:$8 sps:$4 sm:$0xff]   ;;  %v1454_v27 = vld [vmem:[#allocation6 + $0x80] ss:$8 sps:$4 sm:$0xff]  }
  0x3d   :  { %552 = vmatprep.subr.bf16.mxu0 %v1369_v30  ;;  %801 = vmatprep.subr.bf16.mxu1 %v1372_v32  ;;  %v1457_v28 = vld [vmem:[%s1880_s9 + $0x78] sm:$0xff]  }
  0x3e   :  { %v1459_v29 = vld [vmem:[%s1881_s10 + $0x78] sm:$0xff]  }
  0x40   :  { %553 = vmatpush1.bf16.msra.mxu0 %v1367_v33  ;;  %802 = vmatpush1.bf16.msra.mxu1 %v1370_v35  ;;  %v1756_v33 = vsub.s32 0, %v1634_v4 }
  0x41   :  { %554 = vmatprep.subr.bf16.mxu0 %v1375_v34  ;;  %803 = vmatprep.subr.bf16.mxu1 %v1378_v36  ;;  %v312_v36 = vld [vmem:[#allocation4] sm:$0xf] }
  0x44   :  { %555 = vmatpush1.bf16.msra.mxu0 %v1373_v37  ;;  %804 = vmatpush1.bf16.msra.mxu1 %v1376_v39  ;;  %v1759_v37 = vsub.s32 1, %v1634_v4 }
  0x45   :  { %556 = vmatprep.subr.bf16.mxu0 %v1381_v38  ;;  %805 = vmatprep.subr.bf16.mxu1 %v1384_v40  ;;  %v324_v38 = vsub.s32 2, %v1634_v4 }
  0x48   :  { %557 = vmatpush1.bf16.msra.mxu0 %v1379_v41  ;;  %806 = vmatpush1.bf16.msra.mxu1 %v1382_v43  ;;  %v317_v41 = vrot.slane %v312_v36, %v1756_v33 }
  0x49   :  { %558 = vmatprep.subr.bf16.mxu0 %v1387_v42  ;;  %807 = vmatprep.subr.bf16.mxu1 %v1390_v45  ;;  %v328_v42 = vsub.s32 3, %v1634_v4 }
  0x4c   :  { %559 = vmatpush1.bf16.msra.mxu0 %v1385_v44  ;;  %808 = vmatpush1.bf16.msra.mxu1 %v1388_v46  ;;  %v321_v46 = vrot.slane %v312_v36, %v1759_v37 }
  0x4d   :  { %560 = vmatprep.subr.bf16.mxu0 %v1393_v47  ;;  %809 = vmatprep.subr.bf16.mxu1 %v1396_v48  ;;  %v325_v47 = vrot.slane %v312_v36, %v324_v38  ;;  %v1488_v38 = vld [vmem:[%s1881_s10] sm:$0xff]  }
  0x50   :  { %561 = vmatpush1.bf16.msra.mxu0 %v1391_v49  ;;  %810 = vmatpush1.bf16.msra.mxu1 %v1394_v51 }
  0x51   :  { %562 = vmatprep.subr.bf16.mxu0 %v1399_v50  ;;  %811 = vmatprep.subr.bf16.mxu1 %v1402_v52 }
  0x54   :  { %563 = vmatpush1.bf16.msra.mxu0 %v1397_v53  ;;  %812 = vmatpush1.bf16.msra.mxu1 %v1400_v55  ;;  %v329_v53 = vrot.slane %v312_v36, %v328_v42  ;;  %v1487_v36 = vld [vmem:[%s1881_s10 + $0x40] sm:$0xff]  }
  0x55   :  { %564 = vmatprep.subr.bf16.mxu0 %v1405_v54  ;;  %813 = vmatprep.subr.bf16.mxu1 %v1408_v56 }
  0x58   :  { %565 = vmatpush1.bf16.msra.mxu0 %v1403_v57  ;;  %814 = vmatpush1.bf16.msra.mxu1 %v1406_v59 }
  0x59   :  { %566 = vmatprep.subr.bf16.mxu0 %v1411_v58  ;;  %815 = vmatprep.subr.bf16.mxu1 %v1414_v60 }
  0x5c   :  { %567 = vmatpush2.bf16.msra.mxu0 %v1409_v61  ;;  %816 = vmatpush2.bf16.msra.mxu1 %v1412_v63 }
  0x5d   :  { %568 = vmatprep.subr.bf16.mxu0 %v1417_v62  ;;  %817 = vmatprep.subr.bf16.mxu1 %v1420_v0 }
  0x60   :  { %569 = vmatpush2.bf16.msra.mxu0 %v1415_v1  ;;  %818 = vmatpush2.bf16.msra.mxu1 %v1418_v3  ;;  %v1460_v3 = vld [vmem:[%s1881_s10 + $0x38] sm:$0xff]  }
  0x61   :  { %570 = vmatprep.subr.bf16.mxu0 %v1423_v2  ;;  %819 = vmatprep.subr.bf16.mxu1 %v1426_v5 }
  0x64   :  { %571 = vmatpush2.bf16.msra.mxu0 %v1421_v6  ;;  %820 = vmatpush2.bf16.msra.mxu1 %v1424_v7  ;;  %v1463_v6 = vld [vmem:[%s1881_s10 + $0x70] sm:$0xff]  }
  0x65   :  { %572 = vmatprep.subr.bf16.mxu0 %v1429_v8  ;;  %821 = vmatprep.subr.bf16.mxu1 %v1432_v10  ;;  %v1458_v8 = vld [vmem:[%s1880_s9 + $0x38] sm:$0xff]   ;;  %v1461_v10 = vld [vmem:[%s1880_s9 + $0x70] sm:$0xff]  }
  0x68   :  { %573 = vmatpush2.bf16.msra.mxu0 %v1427_v9  ;;  %822 = vmatpush2.bf16.msra.mxu1 %v1430_v11  ;;  %v1464_v11 = vld [vmem:[%s1881_s10 + $0x30] sm:$0xff]  }
  0x69   :  { %574 = vmatprep.subr.bf16.mxu0 %v1435_v12  ;;  %823 = vmatprep.subr.bf16.mxu1 %v1438_v14  ;;  %v1467_v12 = vld [vmem:[%s1881_s10 + $0x68] sm:$0xff]  }
  0x6a   :  { %v1465_v14 = vld [vmem:[%s1880_s9 + $0x68] sm:$0xff]  }
  0x6c   :  { %575 = vmatpush2.bf16.msra.mxu0 %v1433_v13  ;;  %824 = vmatpush2.bf16.msra.mxu1 %v1436_v15  ;;  %v1462_v13 = vld [vmem:[%s1880_s9 + $0x30] sm:$0xff]   ;;  %v1468_v15 = vld [vmem:[%s1881_s10 + $0x28] sm:$0xff]  }
  0x6d   :  { %576 = vmatprep.subr.bf16.mxu0 %v1441_v16  ;;  %825 = vmatprep.subr.bf16.mxu1 %v1444_v18  ;;  %v1471_v16 = vld [vmem:[%s1881_s10 + $0x60] sm:$0xff]  }
  0x6e   :  { %v1469_v18 = vld [vmem:[%s1880_s9 + $0x60] sm:$0xff]  }
  0x70   :  { %577 = vmatpush2.bf16.msra.mxu0 %v1439_v17  ;;  %826 = vmatpush2.bf16.msra.mxu1 %v1442_v19  ;;  %v1466_v17 = vld [vmem:[%s1880_s9 + $0x28] sm:$0xff]   ;;  %v1472_v19 = vld [vmem:[%s1881_s10 + $0x20] sm:$0xff]  }
  0x71   :  { %578 = vmatprep.subr.bf16.mxu0 %v1447_v20  ;;  %827 = vmatprep.subr.bf16.mxu1 %v1450_v22  ;;  %v1475_v20 = vld [vmem:[%s1881_s10 + $0x58] sm:$0xff]  }
  0x72   :  { %v1473_v22 = vld [vmem:[%s1880_s9 + $0x58] sm:$0xff]  }
  0x74   :  { %579 = vmatpush2.bf16.msra.mxu0 %v1445_v21  ;;  %828 = vmatpush2.bf16.msra.mxu1 %v1448_v23  ;;  %v1470_v21 = vld [vmem:[%s1880_s9 + $0x20] sm:$0xff]   ;;  %v1476_v23 = vld [vmem:[%s1881_s10 + $0x18] sm:$0xff]  }
  0x75   :  { %580 = vmatprep.subr.bf16.mxu0 %v1453_v24  ;;  %829 = vmatprep.subr.bf16.mxu1 %v1456_v26  ;;  %v1474_v24 = vld [vmem:[%s1880_s9 + $0x18] sm:$0xff]   ;;  %v1478_v26 = vld [vmem:[%s1880_s9 + $0x10] sm:$0xff]  }
  0x78   :  { %581 = vmatpush2.bf16.msra.mxu0 %v1451_v25  ;;  %830 = vmatpush2.bf16.msra.mxu1 %v1454_v27  ;;  %v1477_v25 = vld [vmem:[%s1880_s9 + $0x50] sm:$0xff]  }
  0x79   :  { %1327 = vmatprep.subr.bf16.mxu1 %v1457_v28  ;;  %1305 = vmatprep.subr.bf16.mxu0 %v1459_v29  ;;  %v1479_v27 = vld [vmem:[%s1881_s10 + $0x50] sm:$0xff]   ;;  %v1481_v29 = vld [vmem:[%s1880_s9 + $0x48] sm:$0xff]  }
  0x7a   :  { %v1480_v28 = vld [vmem:[%s1881_s10 + $0x10] sm:$0xff]  }
  0xf3   :  { %v155_v30 = vpop.f32.mrf.mxu0  ;;  %v196_v32 = vpop.f32.mrf.mxu1 }
  0xf5   :  { %v157_v31 = vpop.f32.mrf.mxu0  ;;  %v198_v35 = vpop.f32.mrf.mxu1 }
  0xf7   :  { %v159_v34 = vpop.f32.mrf.mxu0  ;;  %v200_v40 = vpop.f32.mrf.mxu1 }
  0xf8   :  { %v1485_v34 = vld [vmem:[%s1880_s9 + $0x40] sm:$0xff]  }
  0xf9   :  { %v160_v39 = vpop.f32.mrf.mxu0  ;;  %v201_v43 = vpop.f32.mrf.mxu1  ;;  %v627_v40 = vld [vmem:[%s1879_s8] sm:$0x3] }
  0xfa   :  { %v378_v39 = vld [vmem:[%s1877_s6] sm:$0x3]  ;;  %v632_v43 = vrot.slane %v627_v40, %v1756_v33 }
  0xfb   :  { %v264_v44 = vpop.f32.mrf.mxu0  ;;  %v305_v49 = vpop.f32.mrf.mxu1  ;;  %v387_v42 = vrot.slane %v378_v39, %v1759_v37 }
  0xfc   :  { %v265_v45 = vadd.f32 %v264_v44, %v155_v30  ;;  %v306_v52 = vadd.f32 %v305_v49, %v196_v32  ;;  %v1482_v30 = vld [vmem:[%s1880_s9 + $0x8] sm:$0xff]  }
  0xfd   :  { %v266_v48 = vpop.f32.mrf.mxu0  ;;  %v307_v55 = vpop.f32.mrf.mxu1  ;;  %v1484_v32 = vld [vmem:[%s1881_s10 + $0x8] sm:$0xff]  }
  0xfe   :  { %v334_v50 = vadd.f32 %v317_v41, %v265_v45  ;;  %v267_v51 = vadd.f32 %v266_v48, %v157_v31  ;;  %v336_v57 = vadd.f32 %v325_v47, %v306_v52  ;;  %v308_v58 = vadd.f32 %v307_v55, %v198_v35  ;;  %v1483_v31 = vld [vmem:[%s1881_s10 + $0x48] sm:$0xff]   ;;  %v1486_v35 = vld [vmem:[%s1880_s9] sm:$0xff]  }
  0xff   :  { %v268_v54 = vpop.f32.mrf.mxu0  ;;  %v309_v4 = vpop.f32.mrf.mxu1  ;;  %v383_v41 = vrot.slane %v378_v39, %v1756_v33 }
 0x100   :  { %v335_v56 = vadd.f32 %v321_v46, %v267_v51  ;;  %v338_v59 = vmax.f32 %v334_v50, 0.0  ;;  %v337_v62 = vadd.f32 %v329_v53, %v308_v58  ;;  %v340_v63 = vmax.f32 %v336_v57, 0.0 }
 0x101   :  { %v269_v60 = vpop.f32.mrf.mxu0  ;;  %v310_v0 = vpop.f32.mrf.mxu1  ;;  %v636_v46 = vrot.slane %v627_v40, %v1759_v37 }
 0x102   :  { %v339_v61 = vmax.f32 %v335_v56, 0.0  ;;  %v341_v2 = vmax.f32 %v337_v62, 0.0  ;;  %v342_v5 = vpack.c.bf16 %v338_v59, %v338_v59  ;;  %v344_v9 = vpack.c.bf16 %v340_v63, %v340_v63 }
 0x104   :  { %v343_v1 = vpack.c.bf16 %v339_v61, %v339_v61  ;;  %v345_v7 = vpack.c.bf16 %v341_v2, %v341_v2 }
 0x106   :  { %582 = vmatprep.mubr.bf16.mxu0 %v343_v1  ;;  %831 = vmatprep.mubr.bf16.mxu1 %v345_v7 }
 0x107   :  { %583 = vmatmul.mubr.bf16.vlgmr.msra.gmra.mxu0 %v342_v5  ;;  %832 = vmatmul.mubr.bf16.vlgmr.msra.gmra.mxu1 %v344_v9 }
 0x108   :  { %1306 = vmatpush3.bf16.msra.mxu0 %v1460_v3  ;;  %1328 = vmatpush3.bf16.msra.mxu1 %v1458_v8 }
 0x109   :  { %1307 = vmatprep.subr.bf16.mxu0 %v1463_v6  ;;  %1329 = vmatprep.subr.bf16.mxu1 %v1461_v10  ;;  %v1304_v6 = vld [vmem:[%s1882_s11] ss:$0 sm:$0xff] }
 0x10c   :  { %1308 = vmatpush3.bf16.msra.mxu0 %v1464_v11  ;;  %1330 = vmatpush3.bf16.msra.mxu1 %v1462_v13 }
 0x10d   :  { %1309 = vmatprep.subr.bf16.mxu0 %v1467_v12  ;;  %1331 = vmatprep.subr.bf16.mxu1 %v1465_v14 }
 0x110   :  { %1310 = vmatpush3.bf16.msra.mxu0 %v1468_v15  ;;  %1332 = vmatpush3.bf16.msra.mxu1 %v1466_v17 }
 0x111   :  { %1311 = vmatprep.subr.bf16.mxu0 %v1471_v16  ;;  %1333 = vmatprep.subr.bf16.mxu1 %v1469_v18 }
 0x114   :  { %1312 = vmatpush3.bf16.msra.mxu0 %v1472_v19  ;;  %1334 = vmatpush3.bf16.msra.mxu1 %v1470_v21 }
 0x115   :  { %1313 = vmatprep.subr.bf16.mxu0 %v1475_v20  ;;  %1335 = vmatprep.subr.bf16.mxu1 %v1473_v22 }
 0x118   :  { %1314 = vmatpush3.bf16.msra.mxu0 %v1476_v23  ;;  %1336 = vmatpush3.bf16.msra.mxu1 %v1474_v24 }
 0x119   :  { %1337 = vmatprep.subr.bf16.mxu1 %v1477_v25  ;;  %1315 = vmatprep.subr.bf16.mxu0 %v1479_v27 }
 0x11c   :  { %1338 = vmatpush3.bf16.msra.mxu1 %v1478_v26  ;;  %1316 = vmatpush3.bf16.msra.mxu0 %v1480_v28 }
 0x11d   :  { %1339 = vmatprep.subr.bf16.mxu1 %v1481_v29  ;;  %1317 = vmatprep.subr.bf16.mxu0 %v1483_v31 }
 0x120   :  { %1340 = vmatpush3.bf16.msra.mxu1 %v1482_v30  ;;  %1318 = vmatpush3.bf16.msra.mxu0 %v1484_v32 }
 0x121   :  { %1341 = vmatprep.subr.bf16.mxu1 %v1485_v34  ;;  %1319 = vmatprep.subr.bf16.mxu0 %v1487_v36 }
 0x124   :  { %1342 = vmatpush3.bf16.msra.mxu1 %v1486_v35  ;;  %1320 = vmatpush3.bf16.msra.mxu0 %v1488_v38 }
 0x1c7   :  { %v584_v44 = vpop.f32.mrf.mxu0  ;;  %v833_v48 = vpop.f32.mrf.mxu1 }
 0x1c8   :  { %v585_v45 = vadd.f32 %v584_v44, %v383_v41  ;;  %v834_v50 = vadd.f32 %v833_v48, %v632_v43 }
 0x1c9   :  { %v586_v47 = vpop.f32.mrf.mxu0  ;;  %v835_v53 = vpop.f32.mrf.mxu1 }
 0x1ca   :  { %v587_v49 = vadd.f32 %v586_v47, %v387_v42  ;;  %v591_v51 = vmax.f32 %v585_v45, 0.0  ;;  %v836_v55 = vadd.f32 %v835_v53, %v636_v46  ;;  %v840_v56 = vmax.f32 %v834_v50, 0.0 }
 0x1cb   :  { %v588_v52 = vpop.f32.mrf.mxu0  ;;  %v837_v58 = vpop.f32.mrf.mxu1 }
 0x1cc   :  { %v592_v54 = vmax.f32 %v587_v49, 0.0  ;;  %v841_v60 = vmax.f32 %v836_v55, 0.0  ;;  %v593_v4 = vpack.c.bf16 %v591_v51, %v591_v51  ;;  %v842_v62 = vpack.c.bf16 %v840_v56, %v840_v56 }
 0x1cd   :  { %v589_v57 = vpop.f32.mrf.mxu0  ;;  %v838_v33 = vpop.f32.mrf.mxu1 }
 0x1ce   :  { %v594_v59 = vpack.c.bf16 %v592_v54, %v592_v54  ;;  %v843_v61 = vpack.c.bf16 %v841_v60, %v841_v60 }
 0x1d0   :  { %1172 = vmatprep.mubr.bf16.mxu1 %v594_v59  ;;  %1036 = vmatprep.mubr.bf16.mxu0 %v843_v61 }
 0x1d1   :  { %1173 = vmatmul.mubr.bf16.vlgmr.msra.gmra.mxu1 %v593_v4  ;;  %1037 = vmatmul.mubr.bf16.vlgmr.msra.gmra.mxu0 %v842_v62 }
 0x291   :  { %v1343_v37 = vpop.f32.mrf.mxu1  ;;  %v1321_v63 = vpop.f32.mrf.mxu0 }
 0x293   :  { %v1344_v0 = vpop.f32.mrf.mxu1  ;;  %v1322_v1 = vpop.f32.mrf.mxu0 }
 0x294   :  { %v1345_v3 = vadd.f32 %v1344_v0, %v1343_v37  ;;  %v1323_v5 = vadd.f32 %v1322_v1, %v1321_v63 }
 0x295   :  { %v1346_v2 = vpop.f32.mrf.mxu1  ;;  %v1324_v7 = vpop.f32.mrf.mxu0 }
 0x296   :  { %v1175_v9 = vadd.f32 %v1345_v3, %v1323_v5 }
 0x297   :  { %v1347_v8 = vpop.f32.mrf.mxu1  ;;  %v1325_v10 = vpop.f32.mrf.mxu0 }
 0x298   :  { %v1187_v11 = vadd.f32 %v1304_v6, %v1175_v9 }
 0x29a   :  { %1189 = vst.msk [vmem:[%s1883_s12] sm:$0xff] %vm1188_vm4, %v1187_v11 }
 0x29b   :  { %1194 = vsyncpa [#allocation3], 1 }
 0x29c   :  { %1195 = vsyncpa [#allocation5], 1 }

</bundles_post_ra>
